<compile_context>
chip_gen: v5e
topology: v5e:2x2
jax: 0.10.0
libtpu: 0.0.40
codegen_flags: <defaults>
</compile_context>

<pallas_src>
import math
import functools

import jax
import jax.numpy as jnp
from jax import lax
from jax.experimental import pallas as pl
from jax.experimental.pallas import tpu as pltpu

_INV_SQRT2 = 1.0 / math.sqrt(2.0)
_INV_SQRT2PI = 1.0 / math.sqrt(2.0 * math.pi)
_TINY_VAR = 1e-30


# ---------------------------------------------------------------------------
# Moment math (shared by the Pallas kernel epilogue and the JAX reference)
# ---------------------------------------------------------------------------
def _relu_family_moments(mu_f, var_f, want_neg):
    """ReLU (and optionally negative-ReLU) moments from pre-activation moments.

    All math in f32.  Uses rsqrt (EUP slot) instead of sqrt + divide and clamps
    variances to >= 0 to harden against E[x^2]-mean^2 cancellation.
    """
    var_f = jnp.maximum(var_f, 0.0)
    tiny = var_f <= _TINY_VAR
    safe_var = jnp.where(tiny, 1.0, var_f)
    inv_sigma = lax.rsqrt(safe_var)
    sigma = safe_var * inv_sigma
    alpha = mu_f * inv_sigma
    cdf = 0.5 * (1.0 + lax.erf(alpha * _INV_SQRT2))
    pdf = _INV_SQRT2PI * jnp.exp(-0.5 * alpha * alpha)
    mu_sig_pdf = mu_f * sigma * pdf
    second = var_f + mu_f * mu_f

    relu_mean = mu_f * cdf + sigma * pdf
    relu_var = second * cdf + mu_sig_pdf - relu_mean * relu_mean
    relu_mean = jnp.where(tiny, mu_f * (mu_f > 0.0).astype(mu_f.dtype), relu_mean)
    relu_var = jnp.where(tiny, 0.0, jnp.maximum(relu_var, 0.0))
    if not want_neg:
        return relu_mean, relu_var, None, None

    neg_mean = mu_f * cdf + sigma * pdf - mu_f
    neg_var = second * (1.0 - cdf) - mu_sig_pdf - neg_mean * neg_mean
    neg_mean = jnp.where(tiny, -mu_f * (mu_f < 0.0).astype(mu_f.dtype), neg_mean)
    neg_var = jnp.where(tiny, 0.0, jnp.maximum(neg_var, 0.0))
    return relu_mean, relu_var, neg_mean, neg_var


# ---------------------------------------------------------------------------
# Pallas kernel (non-MAP forward of CLTLinear), tiled over (B, N, K)
# ---------------------------------------------------------------------------
def _clt_kernel(is_input, is_output, act, *refs):
    if is_input:
        mu_h_ref, wmu_ref, wvar_ref, bmu_ref, bvar_ref = refs[:5]
        var_h_ref = None
        rest = refs[5:]
    else:
        mu_h_ref, var_h_ref, wmu_ref, wvar_ref, bmu_ref, bvar_ref = refs[:6]
        rest = refs[6:]

    n_out = 2 if (is_output or act == "relu") else 4
    out_refs = rest[:n_out]
    acc_mu_ref, acc_var_ref = rest[n_out:]

    k = pl.program_id(2)

    @pl.when(k == 0)
    def _init():
        acc_mu_ref[...] = jnp.zeros_like(acc_mu_ref)
        acc_var_ref[...] = jnp.zeros_like(acc_var_ref)

    # Weight tiles stay in PyTorch (out, in) layout -> contract last dims.
    wmu = wmu_ref[...]                       # (tn, tk)
    wvar = wvar_ref[...]                     # (tn, tk)
    cdt = wmu.dtype
    mu_h = mu_h_ref[...].astype(cdt)         # (tm, tk)

    dn = (((1,), (1,)), ((), ()))            # (tm,tk) x (tn,tk) -> (tm,tn)

    acc_mu_ref[...] += lax.dot_general(mu_h, wmu, dn,
                                       preferred_element_type=jnp.float32)
    if is_input:
        acc_var_ref[...] += lax.dot_general(mu_h * mu_h, wvar, dn,
                                            preferred_element_type=jnp.float32)
    else:
        var_h = var_h_ref[...].astype(cdt)
        # (var_h + mu_h^2) @ wvar^T + var_h @ (wmu^2)^T
        #   == var_h @ (wvar + wmu^2)^T + (mu_h^2) @ wvar^T
        # wmu^2 is formed per-tile on the VPU -> one fewer HBM weight stream.
        acc_var_ref[...] += (
            lax.dot_general(var_h, wvar + wmu * wmu, dn,
                            preferred_element_type=jnp.float32)
            + lax.dot_general(mu_h * mu_h, wvar, dn,
                              preferred_element_type=jnp.float32))

    @pl.when(k == pl.num_programs(2) - 1)
    def _epilogue():
        mu_f = acc_mu_ref[...] + bmu_ref[...]
        var_f = jnp.maximum(acc_var_ref[...] + bvar_ref[...], 0.0)
        if is_output:
            # Output layer returns raw moments (also for act='crelu', per spec).
            out_refs[0][...] = mu_f
            out_refs[1][...] = var_f
        else:
            want_neg = act == "crelu"
            pm, pv, nm, nv = _relu_family_moments(mu_f, var_f, want_neg)
            out_refs[0][...] = pm
            out_refs[1][...] = pv
            if want_neg:
                out_refs[2][...] = nm
                out_refs[3][...] = nv


# ---------------------------------------------------------------------------
# Wrapper: layout glue / tiling, hot path in Pallas
# ---------------------------------------------------------------------------
def _pick_tile(dim, target):
    if dim <= target:
        return dim
    if dim % target == 0:
        return target
    # TODO(synk): pad ragged dims to a tileable size instead of falling back to
    # a full-extent block (which limits pipelining for very large ragged dims).
    return dim


def clt_linear_forward(params, mu_h, var_h=None, *, is_input=False,
                       is_output=False, act="relu", use_softplus=False,
                       weight_dtype=jnp.float32,
                       tm_target=256, tn_target=256, tk_target=512):
    """Non-MAP CLTLinear forward.  `weight_dtype=jnp.bfloat16` halves weight
    HBM traffic and hits the native bf16 MXU path (epilogue stays f32)."""
    assert act in ("relu", "crelu")
    if not is_input:
        assert var_h is not None, "non-input layers require an input variance"

    weight_mu = params["weight_mu"].astype(jnp.float32)    # (N, K)
    weight_rho = params["weight_rho"].astype(jnp.float32)  # (N, K)
    bias_mu = params["bias_mu"].astype(jnp.float32)        # (N,)
    bias_rho = params["bias_rho"].astype(jnp.float32)      # (N,)

    N, K = weight_mu.shape
    B = mu_h.shape[0]

    if use_softplus:
        w_std = jnp.log1p(jnp.exp(weight_rho))
        b_std = jnp.log1p(jnp.exp(bias_rho))
    else:
        w_std = jnp.exp(weight_rho)
        b_std = jnp.exp(bias_rho)

    # Weights kept in native (N, K) layout: NO wrapper-side transposes and no
    # materialized weight_mu**2 (that square is done per-tile in the kernel).
    w_mu_in = weight_mu.astype(weight_dtype)
    w_var_in = (w_std * w_std).astype(weight_dtype)
    bmu = bias_mu.reshape(1, N)
    bvar = (b_std * b_std).reshape(1, N)

    mu_h = mu_h.astype(jnp.float32)
    if var_h is not None:
        var_h = var_h.astype(jnp.float32)

    # Pad batch to a sublane multiple (8).
    B_pad = ((B + 7) // 8) * 8
    if B_pad != B:
        pad = ((0, B_pad - B), (0, 0))
        mu_h = jnp.pad(mu_h, pad)
        if var_h is not None:
            var_h = jnp.pad(var_h, pad)

    tm = _pick_tile(B_pad, tm_target)
    tn = _pick_tile(N, tn_target)
    tk = _pick_tile(K, tk_target)
    grid = (B_pad // tm, N // tn, K // tk)

    act_spec = pl.BlockSpec((tm, tk), lambda i, j, k: (i, k))   # (B, K) acts
    w_spec = pl.BlockSpec((tn, tk), lambda i, j, k: (j, k))     # (N, K) weights
    b_spec = pl.BlockSpec((1, tn), lambda i, j, k: (0, j))      # (1, N) biases
    o_spec = pl.BlockSpec((tm, tn), lambda i, j, k: (i, j))     # (B, N) outputs

    if is_input:
        inputs = (mu_h, w_mu_in, w_var_in, bmu, bvar)
        in_specs = [act_spec, w_spec, w_spec, b_spec, b_spec]
    else:
        inputs = (mu_h, var_h, w_mu_in, w_var_in, bmu, bvar)
        in_specs = [act_spec, act_spec, w_spec, w_spec, b_spec, b_spec]

    n_out = 2 if (is_output or act == "relu") else 4
    out_shape = tuple(jax.ShapeDtypeStruct((B_pad, N), jnp.float32)
                      for _ in range(n_out))
    out_specs = [o_spec] * n_out

    n_var_mm = 1 if is_input else 2
    w_bytes = jnp.dtype(weight_dtype).itemsize
    cost = pl.CostEstimate(
        flops=2 * B_pad * N * K * (1 + n_var_mm),
        transcendentals=0 if is_output else 2 * B_pad * N,
        bytes_accessed=(4 * B_pad * K * (1 if is_input else 2)   # activations
                        + 2 * N * K * w_bytes                     # two weight streams
                        + 4 * n_out * B_pad * N                   # outputs
                        + 8 * N),                                 # biases
    )

    kernel = functools.partial(_clt_kernel, is_input, is_output, act)
    outs = pl.pallas_call(
        kernel,
        out_shape=out_shape,
        grid_spec=pltpu.PrefetchScalarGridSpec(
            num_scalar_prefetch=0,
            grid=grid,
            in_specs=in_specs,
            out_specs=out_specs,
            scratch_shapes=[pltpu.VMEM((tm, tn), jnp.float32),   # acc_mu
                            pltpu.VMEM((tm, tn), jnp.float32)],  # acc_var
        ),
        compiler_params=pltpu.CompilerParams(
            dimension_semantics=("parallel", "parallel", "arbitrary")),
        cost_estimate=cost,
    )(*inputs)

    if is_output or act == "relu":
        return outs[0][:B], outs[1][:B]
    # crelu: cat((relu, neg_relu), -1) for both mean and variance.
    # TODO(synk): store directly into a (B, 2N) output in-kernel to drop this
    # concatenate's extra HBM round-trip.
    mean = jnp.concatenate([outs[0], outs[2]], axis=-1)[:B]
    var = jnp.concatenate([outs[1], outs[3]], axis=-1)[:B]
    return mean, var


# ---------------------------------------------------------------------------
# Deterministic parameter initialization (matches reset_parameters() shapes)
# ---------------------------------------------------------------------------
def init_clt_params(key, in_features, out_features):
    k_w, k_b = jax.random.split(key)
    bound = 1.0 / math.sqrt(in_features)   # kaiming_uniform_(a=sqrt(5))
    weight_mu = jax.random.uniform(k_w, (out_features, in_features),
                                   jnp.float32, -bound, bound)
    weight_rho = jnp.full((out_features, in_features), -4.6, jnp.float32)
    bias_mu = jax.random.uniform(k_b, (out_features,), jnp.float32, -bound, bound)
    bias_rho = jnp.full((out_features,), -4.6, jnp.float32)
    return dict(weight_mu=weight_mu, weight_rho=weight_rho,
                bias_mu=bias_mu, bias_rho=bias_rho)


# ---------------------------------------------------------------------------
# Pure-JAX reference (for correctness checking)
# ---------------------------------------------------------------------------
def clt_linear_reference(params, mu_h, var_h=None, *, is_input=False,
                         is_output=False, act="relu", use_softplus=False):
    weight_mu = params["weight_mu"]
    weight_rho = params["weight_rho"]
    bias_mu = params["bias_mu"]
    bias_rho = params["bias_rho"]
    if use_softplus:
        w_std = jnp.log1p(jnp.exp(weight_rho))
        b_std = jnp.log1p(jnp.exp(bias_rho))
    else:
        w_std = jnp.exp(weight_rho)
        b_std = jnp.exp(bias_rho)

    mu_f = mu_h @ weight_mu.T + bias_mu
    if is_input:
        var_f = (mu_h ** 2) @ (w_std ** 2).T + b_std ** 2
    else:
        var_f = ((var_h + mu_h ** 2) @ (w_std ** 2).T + b_std ** 2
                 + var_h @ (weight_mu ** 2).T)
    if is_output:
        return mu_f, var_f
    pm, pv, nm, nv = _relu_family_moments(mu_f, var_f, act == "crelu")
    if act == "relu":
        return pm, pv
    return jnp.concatenate([pm, nm], -1), jnp.concatenate([pv, nv], -1)


if __name__ == "__main__":
    B, IN, OUT = 8, 32, 32

    key = jax.random.PRNGKey(0)
    k_p, k_mu, k_var = jax.random.split(key, 3)

    params = init_clt_params(k_p, IN, OUT)
    mu_h = jax.random.normal(k_mu, (B, IN), jnp.float32)
    var_h = jax.nn.softplus(jax.random.normal(k_var, (B, IN), jnp.float32))

    # Hidden CLT layer: not input, not output, relu activation, non-MAP.
    mean_out, var_out = clt_linear_forward(params, mu_h, var_h,
                                           is_input=False, is_output=False,
                                           act="relu")
    jax.block_until_ready((mean_out, var_out))
    ref_mean, ref_var = clt_linear_reference(params, mu_h, var_h,
                                             is_input=False, is_output=False,
                                             act="relu")
    assert mean_out.shape == (B, OUT) and var_out.shape == (B, OUT)
    assert jnp.allclose(mean_out, ref_mean, rtol=1e-4, atol=1e-4)
    assert jnp.allclose(var_out, ref_var, rtol=1e-4, atol=1e-4)

    # Input layer with crelu activation.
    m2, v2 = clt_linear_forward(params, mu_h, is_input=True, act="crelu")
    jax.block_until_ready((m2, v2))
    rm2, rv2 = clt_linear_reference(params, mu_h, is_input=True, act="crelu")
    assert m2.shape == (B, 2 * OUT) and v2.shape == (B, 2 * OUT)
    assert jnp.allclose(m2, rm2, rtol=1e-4, atol=1e-4)
    assert jnp.allclose(v2, rv2, rtol=1e-4, atol=1e-4)

    # Output layer: raw moments, no activation applied.
    m3, v3 = clt_linear_forward(params, mu_h, var_h, is_output=True)
    jax.block_until_ready((m3, v3))
    rm3, rv3 = clt_linear_reference(params, mu_h, var_h, is_output=True)
    assert jnp.allclose(m3, rm3, rtol=1e-4, atol=1e-4)
    assert jnp.allclose(v3, rv3, rtol=1e-4, atol=1e-4)

    print("KERNEL_OK")
</pallas_src>

<mosaic_0001>
module attributes {stable_mosaic.version = 11 : i64} {
  func.func @_clt_kernel(%arg0: i32, %arg1: i32, %arg2: i32, %arg3: memref<8x32xf32, #tpu.memory_space<vmem>>, %arg4: memref<8x32xf32, #tpu.memory_space<vmem>>, %arg5: memref<32x32xf32, #tpu.memory_space<vmem>>, %arg6: memref<32x32xf32, #tpu.memory_space<vmem>>, %arg7: memref<1x32xf32, #tpu.memory_space<vmem>>, %arg8: memref<1x32xf32, #tpu.memory_space<vmem>>, %arg9: memref<8x32xf32, #tpu.memory_space<vmem>>, %arg10: memref<8x32xf32, #tpu.memory_space<vmem>>, %arg11: memref<8x32xf32, #tpu.memory_space<vmem>>, %arg12: memref<8x32xf32, #tpu.memory_space<vmem>>) attributes {dimension_semantics = [#tpu.dimension_semantics<parallel>, #tpu.dimension_semantics<parallel>, #tpu.dimension_semantics<arbitrary>], iteration_bounds = array<i64: 1, 1, 1>, scalar_prefetch = 0 : i64, scratch_operands = 2 : i64, tpu.core_type = #tpu.core_type<tc>, window_params = [{transform_indices = @transform_0, window_bounds = array<i64: 8, 32>}, {transform_indices = @transform_1, window_bounds = array<i64: 8, 32>}, {transform_indices = @transform_2, window_bounds = array<i64: 32, 32>}, {transform_indices = @transform_3, window_bounds = array<i64: 32, 32>}, {transform_indices = @transform_4, window_bounds = array<i64: 1, 32>}, {transform_indices = @transform_5, window_bounds = array<i64: 1, 32>}, {transform_indices = @transform_6, window_bounds = array<i64: 8, 32>}, {transform_indices = @transform_7, window_bounds = array<i64: 8, 32>}]} {
    %c0_i32 = arith.constant 0 : i32
    %0 = arith.cmpi eq, %arg2, %c0_i32 : i32
    %1 = arith.extui %0 : i1 to i32
    %c0_i32_0 = arith.constant 0 : i32
    %2 = arith.cmpi ne, %1, %c0_i32_0 : i32
    scf.if %2 {
      %cst_20 = arith.constant 0.000000e+00 : f32
      %23 = vector.broadcast %cst_20 : f32 to vector<8x32xf32>
      %c0_21 = arith.constant 0 : index
      %c0_22 = arith.constant 0 : index
      %24 = vector.load %arg11[%c0_21, %c0_22] : memref<8x32xf32, #tpu.memory_space<vmem>>, vector<8x32xf32>
      tpu.vector_store %arg11[%c0_21, %c0_22], %23 {strides = array<i32>} : memref<8x32xf32, #tpu.memory_space<vmem>>, vector<8x32xf32>,
      %cst_23 = arith.constant 0.000000e+00 : f32
      %25 = vector.broadcast %cst_23 : f32 to vector<8x32xf32>
      %c0_24 = arith.constant 0 : index
      %c0_25 = arith.constant 0 : index
      %26 = vector.load %arg12[%c0_24, %c0_25] : memref<8x32xf32, #tpu.memory_space<vmem>>, vector<8x32xf32>
      tpu.vector_store %arg12[%c0_24, %c0_25], %25 {strides = array<i32>} : memref<8x32xf32, #tpu.memory_space<vmem>>, vector<8x32xf32>,
    } else {
    }
    %c0 = arith.constant 0 : index
    %c0_1 = arith.constant 0 : index
    %3 = vector.load %arg5[%c0, %c0_1] : memref<32x32xf32, #tpu.memory_space<vmem>>, vector<32x32xf32>
    %c0_2 = arith.constant 0 : index
    %c0_3 = arith.constant 0 : index
    %4 = vector.load %arg6[%c0_2, %c0_3] : memref<32x32xf32, #tpu.memory_space<vmem>>, vector<32x32xf32>
    %c0_4 = arith.constant 0 : index
    %c0_5 = arith.constant 0 : index
    %5 = vector.load %arg3[%c0_4, %c0_5] : memref<8x32xf32, #tpu.memory_space<vmem>>, vector<8x32xf32>
    %c0_6 = arith.constant 0 : index
    %c0_7 = arith.constant 0 : index
    %6 = vector.load %arg11[%c0_6, %c0_7] : memref<8x32xf32, #tpu.memory_space<vmem>>, vector<8x32xf32>
    %cst = arith.constant dense<0.000000e+00> : vector<8x32xf32>
    %7 = tpu.matmul %5, %3, %cst {dimension_numbers = #tpu.dot_dimension_numbers<[1], [1], [0], [0], [0, 0, 1, 0], [], []>} : vector<8x32xf32>, vector<32x32xf32>, vector<8x32xf32> -> vector<8x32xf32>
    %8 = arith.addf %6, %7 : vector<8x32xf32>
    %c0_8 = arith.constant 0 : index
    %c0_9 = arith.constant 0 : index
    %9 = vector.load %arg11[%c0_8, %c0_9] : memref<8x32xf32, #tpu.memory_space<vmem>>, vector<8x32xf32>
    tpu.vector_store %arg11[%c0_8, %c0_9], %8 {strides = array<i32>} : memref<8x32xf32, #tpu.memory_space<vmem>>, vector<8x32xf32>,
    %c0_10 = arith.constant 0 : index
    %c0_11 = arith.constant 0 : index
    %10 = vector.load %arg4[%c0_10, %c0_11] : memref<8x32xf32, #tpu.memory_space<vmem>>, vector<8x32xf32>
    %c0_12 = arith.constant 0 : index
    %c0_13 = arith.constant 0 : index
    %11 = vector.load %arg12[%c0_12, %c0_13] : memref<8x32xf32, #tpu.memory_space<vmem>>, vector<8x32xf32>
    %12 = arith.mulf %3, %3 : vector<32x32xf32>
    %13 = arith.addf %4, %12 : vector<32x32xf32>
    %cst_14 = arith.constant dense<0.000000e+00> : vector<8x32xf32>
    %14 = tpu.matmul %10, %13, %cst_14 {dimension_numbers = #tpu.dot_dimension_numbers<[1], [1], [0], [0], [0, 0, 1, 0], [], []>} : vector<8x32xf32>, vector<32x32xf32>, vector<8x32xf32> -> vector<8x32xf32>
    %15 = arith.mulf %5, %5 : vector<8x32xf32>
    %cst_15 = arith.constant dense<0.000000e+00> : vector<8x32xf32>
    %16 = tpu.matmul %15, %4, %cst_15 {dimension_numbers = #tpu.dot_dimension_numbers<[1], [1], [0], [0], [0, 0, 1, 0], [], []>} : vector<8x32xf32>, vector<32x32xf32>, vector<8x32xf32> -> vector<8x32xf32>
    %17 = arith.addf %14, %16 : vector<8x32xf32>
    %18 = arith.addf %11, %17 : vector<8x32xf32>
    %c0_16 = arith.constant 0 : index
    %c0_17 = arith.constant 0 : index
    %19 = vector.load %arg12[%c0_16, %c0_17] : memref<8x32xf32, #tpu.memory_space<vmem>>, vector<8x32xf32>
    tpu.vector_store %arg12[%c0_16, %c0_17], %18 {strides = array<i32>} : memref<8x32xf32, #tpu.memory_space<vmem>>, vector<8x32xf32>,
    %c0_i32_18 = arith.constant 0 : i32
    %20 = arith.cmpi eq, %arg2, %c0_i32_18 : i32
    %21 = arith.extui %20 : i1 to i32
    %c0_i32_19 = arith.constant 0 : i32
    %22 = arith.cmpi ne, %21, %c0_i32_19 : i32
    scf.if %22 {
      %c0_20 = arith.constant 0 : index
      %c0_21 = arith.constant 0 : index
      %23 = vector.load %arg11[%c0_20, %c0_21] : memref<8x32xf32, #tpu.memory_space<vmem>>, vector<8x32xf32>
      %c0_22 = arith.constant 0 : index
      %c0_23 = arith.constant 0 : index
      %24 = vector.load %arg7[%c0_22, %c0_23] : memref<1x32xf32, #tpu.memory_space<vmem>>, vector<1x32xf32>
      %25 = vector.broadcast %24 : vector<1x32xf32> to vector<8x32xf32>
      %26 = arith.addf %23, %25 : vector<8x32xf32>
      %c0_24 = arith.constant 0 : index
      %c0_25 = arith.constant 0 : index
      %27 = vector.load %arg12[%c0_24, %c0_25] : memref<8x32xf32, #tpu.memory_space<vmem>>, vector<8x32xf32>
      %c0_26 = arith.constant 0 : index
      %c0_27 = arith.constant 0 : index
      %28 = vector.load %arg8[%c0_26, %c0_27] : memref<1x32xf32, #tpu.memory_space<vmem>>, vector<1x32xf32>
      %29 = vector.broadcast %28 : vector<1x32xf32> to vector<8x32xf32>
      %30 = arith.addf %27, %29 : vector<8x32xf32>
      %cst_28 = arith.constant 0.000000e+00 : f32
      %31 = vector.broadcast %cst_28 : f32 to vector<8x32xf32>
      %32 = arith.maximumf %30, %31 : vector<8x32xf32>
      %cst_29 = arith.constant 0.000000e+00 : f32
      %33 = vector.broadcast %cst_29 : f32 to vector<8x32xf32>
      %34 = arith.maximumf %32, %33 : vector<8x32xf32>
      %cst_30 = arith.constant 1.000000e-30 : f32
      %35 = vector.broadcast %cst_30 : f32 to vector<8x32xf32>
      %36 = arith.cmpf ole, %34, %35 : vector<8x32xf32>
      %cst_31 = arith.constant 1.000000e+00 : f32
      %37 = vector.broadcast %cst_31 : f32 to vector<8x32xf32>
      %38 = arith.select %36, %37, %34 : vector<8x32xi1>, vector<8x32xf32>
      %39 = math.rsqrt %38 : vector<8x32xf32>
      %40 = arith.mulf %38, %39 : vector<8x32xf32>
      %41 = arith.mulf %26, %39 : vector<8x32xf32>
      %cst_32 = arith.constant 0.707106769 : f32
      %42 = vector.broadcast %cst_32 : f32 to vector<8x32xf32>
      %43 = arith.mulf %41, %42 : vector<8x32xf32>
      %44 = math.erf %43 : vector<8x32xf32>
      %cst_33 = arith.constant 1.000000e+00 : f32
      %45 = vector.broadcast %cst_33 : f32 to vector<8x32xf32>
      %46 = arith.addf %45, %44 : vector<8x32xf32>
      %cst_34 = arith.constant 5.000000e-01 : f32
      %47 = vector.broadcast %cst_34 : f32 to vector<8x32xf32>
      %48 = arith.mulf %47, %46 : vector<8x32xf32>
      %cst_35 = arith.constant -5.000000e-01 : f32
      %49 = vector.broadcast %cst_35 : f32 to vector<8x32xf32>
      %50 = arith.mulf %49, %41 : vector<8x32xf32>
      %51 = arith.mulf %50, %41 : vector<8x32xf32>
      %52 = math.exp %51 : vector<8x32xf32>
      %cst_36 = arith.constant 0.398942292 : f32
      %53 = vector.broadcast %cst_36 : f32 to vector<8x32xf32>
      %54 = arith.mulf %53, %52 : vector<8x32xf32>
      %55 = arith.mulf %26, %40 : vector<8x32xf32>
      %56 = arith.mulf %55, %54 : vector<8x32xf32>
      %57 = arith.mulf %26, %26 : vector<8x32xf32>
      %58 = arith.addf %34, %57 : vector<8x32xf32>
      %59 = arith.mulf %26, %48 : vector<8x32xf32>
      %60 = arith.mulf %40, %54 : vector<8x32xf32>
      %61 = arith.addf %59, %60 : vector<8x32xf32>
      %62 = arith.mulf %58, %48 : vector<8x32xf32>
      %63 = arith.addf %62, %56 : vector<8x32xf32>
      %64 = arith.mulf %61, %61 : vector<8x32xf32>
      %65 = arith.subf %63, %64 : vector<8x32xf32>
      %cst_37 = arith.constant 0.000000e+00 : f32
      %66 = vector.broadcast %cst_37 : f32 to vector<8x32xf32>
      %67 = arith.cmpf ogt, %26, %66 : vector<8x32xf32>
      %68 = arith.extui %67 : vector<8x32xi1> to vector<8x32xi32>
      %69 = arith.sitofp %68 : vector<8x32xi32> to vector<8x32xf32>
      %70 = arith.mulf %26, %69 : vector<8x32xf32>
      %71 = arith.select %36, %70, %61 : vector<8x32xi1>, vector<8x32xf32>
      %cst_38 = arith.constant 0.000000e+00 : f32
      %72 = vector.broadcast %cst_38 : f32 to vector<8x32xf32>
      %73 = arith.maximumf %65, %72 : vector<8x32xf32>
      %cst_39 = arith.constant 0.000000e+00 : f32
      %74 = vector.broadcast %cst_39 : f32 to vector<8x32xf32>
      %75 = arith.select %36, %74, %73 : vector<8x32xi1>, vector<8x32xf32>
      %c0_40 = arith.constant 0 : index
      %c0_41 = arith.constant 0 : index
      %76 = vector.load %arg9[%c0_40, %c0_41] : memref<8x32xf32, #tpu.memory_space<vmem>>, vector<8x32xf32>
      tpu.vector_store %arg9[%c0_40, %c0_41], %71 {strides = array<i32>} : memref<8x32xf32, #tpu.memory_space<vmem>>, vector<8x32xf32>,
      %c0_42 = arith.constant 0 : index
      %c0_43 = arith.constant 0 : index
      %77 = vector.load %arg10[%c0_42, %c0_43] : memref<8x32xf32, #tpu.memory_space<vmem>>, vector<8x32xf32>
      tpu.vector_store %arg10[%c0_42, %c0_43], %75 {strides = array<i32>} : memref<8x32xf32, #tpu.memory_space<vmem>>, vector<8x32xf32>,
    } else {
    }
    return
  }
  func.func @transform_0(%arg0: i32, %arg1: i32, %arg2: i32) -> (i32, i32) {
    %c0_i32 = arith.constant 0 : i32
    return %arg0, %arg2 : i32, i32
  }
  func.func @transform_1(%arg0: i32, %arg1: i32, %arg2: i32) -> (i32, i32) {
    %c0_i32 = arith.constant 0 : i32
    return %arg0, %arg2 : i32, i32
  }
  func.func @transform_2(%arg0: i32, %arg1: i32, %arg2: i32) -> (i32, i32) {
    %c0_i32 = arith.constant 0 : i32
    return %arg1, %arg2 : i32, i32
  }
  func.func @transform_3(%arg0: i32, %arg1: i32, %arg2: i32) -> (i32, i32) {
    %c0_i32 = arith.constant 0 : i32
    return %arg1, %arg2 : i32, i32
  }
  func.func @transform_4(%arg0: i32, %arg1: i32, %arg2: i32) -> (i32, i32) {
    %c0_i32 = arith.constant 0 : i32
    %c0_i32_0 = arith.constant 0 : i32
    return %c0_i32, %arg1 : i32, i32
  }
  func.func @transform_5(%arg0: i32, %arg1: i32, %arg2: i32) -> (i32, i32) {
    %c0_i32 = arith.constant 0 : i32
    %c0_i32_0 = arith.constant 0 : i32
    return %c0_i32, %arg1 : i32, i32
  }
  func.func @transform_6(%arg0: i32, %arg1: i32, %arg2: i32) -> (i32, i32) {
    %c0_i32 = arith.constant 0 : i32
    return %arg0, %arg1 : i32, i32
  }
  func.func @transform_7(%arg0: i32, %arg1: i32, %arg2: i32) -> (i32, i32) {
    %c0_i32 = arith.constant 0 : i32
    return %arg0, %arg1 : i32, i32
  }
}

</mosaic_0001>

<bundles_post_ra>
// kernel: tpu_custom_call.1
= control target key start
LH: loop header
LB: loop body
LE: loop exit
PB: predicated region body
PF: predicated region fallthrough
CT: control target
= control target key end

     0   :  { %13 = vsyncpa [#allocation5], 0  ;;  %s663_s0 = inlined_call_operand.hbm [shape: f32[8,32], index: 0, kind: input, shape index: {}]   ;;  %s664_s1 = inlined_call_operand.hbm [shape: f32[8,32], index: 1, kind: input, shape index: {}]   ;;  %s665_s2 = inlined_call_operand.hbm [shape: f32[32,32], index: 2, kind: input, shape index: {}]   ;;  %s666_s3 = inlined_call_operand.hbm [shape: f32[32,32], index: 3, kind: input, shape index: {}]   ;;  %s667_s4 = inlined_call_operand.vmem [shape: f32[1,32], index: 4, kind: input, shape index: {}]   ;;  %s668_s5 = inlined_call_operand.vmem [shape: f32[1,32], index: 5, kind: input, shape index: {}]   ;;  %s669_s6 = inlined_call_operand.hbm [shape: f32[8,32], index: 6, kind: output, shape index: {0}]   ;;  %s670_s7 = inlined_call_operand.hbm [shape: f32[8,32], index: 7, kind: output, shape index: {1}]  }
   0x1   :  { %14 = vsyncpa [#allocation8], 0 }
   0x2   :  { %15 = vsyncpa [#allocation11], 0 }
   0x3   :  { %16 = vsyncpa [#allocation6], 0  ;;  %s34_s26 = sshll.u32 %s664_s1, 4  ;;  %s35_s26 = int_to_ptr.hbm [resolvable:$true] %s34_s26 }
   0x4   :  { %17 = vsyncpa [#allocation14], 0  ;;  %s546_s27 = smov [#allocation7]   ;;  %s23_s8 = sshll.u32 %s663_s0, 4  ;;  %s24_s8 = int_to_ptr.hbm [resolvable:$true] %s23_s8 }
   0x5   :  { %s36_s28 = sshll.u32 %s546_s27, 4  ;;  %s547_s9 = smov [#allocation4]   ;;  %s37_s28 = int_to_ptr.vmem [resolvable:$true] %s36_s28 }
   0x6   :  { %39 = dma.hbm_to_vmem [thread:$0]  %s35_s26, 128, %s37_s28, [#allocation8]  }
   0x7   :  { %s25_s10 = sshll.u32 %s547_s9, 4  ;;  %s44_s13 = sshll.u32 %s665_s2, 4  ;;  %s26_s10 = int_to_ptr.vmem [resolvable:$true] %s25_s10  ;;  %s45_s13 = int_to_ptr.hbm [resolvable:$true] %s44_s13 }
   0x8   :  { %28 = dma.hbm_to_vmem [thread:$0]  %s24_s8, 128, %s26_s10, [#allocation5]  }
   0x9   :  { %s548_s1 = smov [#allocation9]   ;;  %s57_s17 = sshll.u32 %s666_s3, 4  ;;  %s58_s17 = int_to_ptr.hbm [resolvable:$true] %s57_s17 }
   0xa   :  { %s46_s14 = sshll.u32 %s548_s1, 4  ;;  %s549_s18 = smov 128   ;;  %s47_s14 = int_to_ptr.vmem [resolvable:$true] %s46_s14 }
   0xb   :  { %s550_s0 = smov 8   ;;  %s551_s19 = smov [#allocation10]  }
   0xc   :  { %52 = dma.hbm_to_vmem [thread:$0]  %s45_s13, 512, %s47_s14, [#allocation8], %s549_s18, %s549_s18, %s550_s0  }
   0xd   :  { %s59_s20 = sshll.u32 %s551_s19, 4  ;;  %s60_s20 = int_to_ptr.vmem [resolvable:$true] %s59_s20 }
   0xe   :  { %65 = dma.hbm_to_vmem [thread:$0]  %s58_s17, 512, %s60_s20, [#allocation11], %s549_s18, %s549_s18, %s550_s0  }
   0xf   :  { %536 = dma.done.wait [#allocation5], 128  }
  0x10   :  { %537 = vsyncadd [#allocation5], 4294967168 }
  0x11   :  { %538 = dma.done.wait [#allocation8], 640  }
  0x12   :  { %539 = vsyncadd [#allocation8], 4294966656 }
  0x13   :  { %540 = dma.done.wait [#allocation11], 512  }
  0x14   :  { %541 = vsyncadd [#allocation11], 4294966784  ;;  %vm90_vm0 = vcmask 261120   ;;  %v96_v0 = vld [vmem:[#allocation9 + $0x18] sm:$0xff]  ;;  %v95_v2 = vld [vmem:[#allocation9 + $0x10] sm:$0xff]  ;;  %v552_v19 = vmov 0.0  }
  0x15   :  { %v100_v1 = vld [vmem:[#allocation10 + $0x18] sm:$0xff]  ;;  %v146_v3 = vmul.f32 %v96_v0, %v96_v0  ;;  %v145_v4 = vmul.f32 %v95_v2, %v95_v2  ;;  %358 = vmatpush.xpose.msk.msra.mxu0 %vm90_vm0, %v96_v0  ;;  %v99_v5 = vld [vmem:[#allocation10 + $0x10] sm:$0xff]  ;;  %v94_v6 = vld [vmem:[#allocation9 + $0x8] sm:$0xff]  ;;  %92 = vst.msk [vmem:[#allocation3] sm:$0xff] %vm90_vm0, %v552_v19  ;;  %s330_s25 = sshll.u32 %s669_s6, 4  ;;  %s554_s26 = smov [#allocation13]   ;;  %s331_s25 = int_to_ptr.hbm [resolvable:$true] %s330_s25 }
  0x16   :  { %363 = vmatpush.xpose.msk.msra.mxu1 %vm90_vm0, %v100_v1  ;;  %v144_v9 = vmul.f32 %v94_v6, %v94_v6  ;;  %v98_v10 = vld [vmem:[#allocation10 + $0x8] sm:$0xff]  ;;  %v93_v11 = vld [vmem:[#allocation9] sm:$0xff]  ;;  %v101_v14 = vld [vmem:[#allocation4] sm:$0xff]  ;;  %91 = vst.msk [vmem:[#allocation2] sm:$0xff] %vm90_vm0, %v552_v19  ;;  %s339_s27 = sshll.u32 %s554_s26, 4  ;;  %s341_s6 = sshll.u32 %s670_s7, 4  ;;  %s340_s27 = int_to_ptr.vmem [resolvable:$true] %s339_s27  ;;  %s342_s6 = int_to_ptr.hbm [resolvable:$true] %s341_s6 }
  0x17   :  { %v150_v7 = vadd.f32 %v146_v3, %v100_v1  ;;  %v149_v8 = vadd.f32 %v145_v4, %v99_v5  ;;  %v143_v13 = vmul.f32 %v93_v11, %v93_v11  ;;  %v97_v15 = vld [vmem:[#allocation10] sm:$0xff]  ;;  %v151_v16 = vmul.f32 %v101_v14, %v101_v14  ;;  %v141_v18 = vld [vmem:[#allocation7] sm:$0xff] }
  0x18   :  { %v148_v12 = vadd.f32 %v144_v9, %v98_v10  ;;  %v385_v28 = vld [vmem:[%s668_s5] ss:$0 sm:$0xff] }
  0x19   :  { %368 = vmatpush.xpose.msk.msra.mxu2 %vm90_vm0, %v150_v7  ;;  %359 = vmatpush.xpose.msk.msra.mxu0 %vm90_vm0, %v95_v2  ;;  %v147_v17 = vadd.f32 %v143_v13, %v97_v15  ;;  %v384_v38 = vld [vmem:[%s667_s4] ss:$0 sm:$0xff]  ;;  %s553_s4 = smov [#allocation12]  }
  0x1a   :  { %364 = vmatpush.xpose.msk.msra.mxu1 %vm90_vm0, %v99_v5  ;;  %s328_s5 = sshll.u32 %s553_s4, 4  ;;  %s329_s5 = int_to_ptr.vmem [resolvable:$true] %s328_s5 }
  0x1c   :  { %v142_v24 = vld [vmem:[#allocation3] sm:$0xff] }
  0x1d   :  { %369 = vmatpush.xpose.msk.msra.mxu2 %vm90_vm0, %v149_v8  ;;  %360 = vmatpush.xpose.msk.msra.mxu0 %vm90_vm0, %v94_v6  ;;  %v102_v20 = vld [vmem:[#allocation2] sm:$0xff] }
  0x1e   :  { %365 = vmatpush.xpose.msk.msra.mxu1 %vm90_vm0, %v98_v10 }
  0x21   :  { %370 = vmatpush.xpose.msk.msra.mxu2 %vm90_vm0, %v148_v12  ;;  %361 = vmatpush.xpose.msk.msra.mxu0 %vm90_vm0, %v93_v11 }
  0x22   :  { %366 = vmatpush.xpose.msk.msra.mxu1 %vm90_vm0, %v97_v15 }
  0x24   :  { %362 = vmatmul.msk.f32.vlgmr.msra.gmra.mxu0 %vm90_vm0, %v101_v14 }
  0x25   :  { %367 = vmatmul.msk.f32.vlgmr.msra.gmra.mxu1 %vm90_vm0, %v151_v16  ;;  %371 = vmatpush.xpose.msk.msra.mxu2 %vm90_vm0, %v147_v17 }
  0x28   :  { %372 = vmatmul.msk.f32.vlgmr.msra.gmra.mxu2 %vm90_vm0, %v141_v18 }
  0xa1   :  { %v136_v21 = vpop.f32.mrf.mxu0 }
  0xa2   :  { %v139_v22 = vadd.f32 %v136_v21, %v102_v20  ;;  %v184_v23 = vpop.f32.mrf.mxu1 }
  0xa4   :  { %140 = vst.msk [vmem:[#allocation2] sm:$0xff] %vm90_vm0, %v139_v22 }
  0xab   :  { %v219_v25 = vpop.f32.mrf.mxu2  ;;  %v227_v39 = vld [vmem:[#allocation2] sm:$0xff] }
  0xac   :  { %v220_v26 = vadd.f32 %v219_v25, %v184_v23  ;;  %v640_v42 = vadd.f32 %v384_v38, %v227_v39 }
  0xae   :  { %v222_v27 = vadd.f32 %v220_v26, %v142_v24  ;;  %v305_v23 = vmul.f32 %v640_v42, %v640_v42  ;;  %vm314_vm9 = vcmp.gt.f32.partialorder %v640_v42, 0.0 }
  0xb0   :  { %223 = vst.msk [vmem:[#allocation3] sm:$0xff] %vm90_vm0, %v222_v27 }
  0xb7   :  { %v233_v29 = vld [vmem:[#allocation3] sm:$0xff] }
  0xb8   :  { %v238_v30 = vadd.f32 %v385_v28, %v233_v29  ;;  %v374_v29 = vsel %vm314_vm9, 1.0, %v552_v19 }
  0xba   :  { %v239_v31 = vmax.f32 %v238_v30, 0.0 }
  0xbc   :  { %v631_v32 = vmax.f32 %v239_v31, 0.0 }
  0xbe   :  { %vm241_vm1 = vcmp.le.f32.partialorder %v631_v32, 1e-30  ;;  %v306_v28 = vadd.f32 %v305_v23, %v631_v32 }
  0xbf   :  { %v242_v33 = vsel %vm241_vm1, 1.0, %v631_v32 }
  0xc0   :  { %386 = vrsqrt.f32 %v242_v33  ;;  %vm249_vm3 = vweird.f32 %v242_v33 }
  0xc6   :  { %v387_v34 = vpop.eup %386 }
  0xc7   :  { %v244_v35 = vmul.f32 %v387_v34, %v242_v33  ;;  %vm250_vm2 = vweird.f32 %v387_v34 }
  0xc8   :  { %vm251_vm4 = vmor %vm249_vm3, %vm250_vm2 }
  0xc9   :  { %v245_v36 = vmul.f32 %v387_v34, %v244_v35 }
  0xcb   :  { %v246_v37 = vmul.f32 0.5, %v245_v36  ;;  %v317_v36 = vmul.f32 %v374_v29, %v640_v42 }
  0xcd   :  { %v247_v40 = vsub.f32 1.5, %v246_v37 }
  0xcf   :  { %v248_v41 = vmul.f32 %v387_v34, %v247_v40 }
  0xd1   :  { %v252_v43 = vsel %vm251_vm4, %v387_v34, %v248_v41 }
  0xd2   :  { %v254_v44 = vmul.f32 %v252_v43, %v640_v42  ;;  %v253_v21 = vmul.f32 %v252_v43, %v242_v33 }
  0xd4   :  { %v255_v45 = vmul.f32 0.70710677, %v254_v44  ;;  %v298_v1 = vmul.f32 -0.5, %v254_v44  ;;  %v303_v27 = vmul.f32 %v253_v21, %v640_v42 }
  0xd6   :  { %v256_v46 = vmul.f32 %v255_v45, %v255_v45  ;;  %v299_v3 = vmul.f32 %v298_v1, %v254_v44 }
  0xd8   :  { %v257_v47 = vmin.f32 %v256_v46, 16.0  ;;  %v300_v7 = vmul.f32 1.442695, %v299_v3 }
  0xda   :  { %v258_v48 = vmul.f32 2.1237322e-06, %v257_v47  ;;  %v269_v49 = vmul.f32 3.8918573e-05, %v257_v47 }
  0xdc   :  { %v259_v50 = vadd.f32 0.00028619796, %v258_v48  ;;  %v270_v51 = vadd.f32 0.001143296, %v269_v49 }
  0xde   :  { %v260_v52 = vmul.f32 %v259_v50, %v257_v47  ;;  %v271_v53 = vmul.f32 %v270_v51, %v257_v47 }
  0xe0   :  { %v272_v54 = vadd.f32 0.014752088, %v271_v53  ;;  %v261_v55 = vadd.f32 0.0036580483, %v260_v52 }
  0xe2   :  { %v273_v56 = vmul.f32 %v272_v54, %v257_v47  ;;  %v262_v58 = vmul.f32 %v261_v55, %v257_v47 }
  0xe4   :  { %v274_v57 = vadd.f32 0.112945676, %v273_v56  ;;  %v263_v61 = vadd.f32 0.05243302, %v262_v58 }
  0xe6   :  { %v275_v59 = vmul.f32 %v274_v57, %v257_v47  ;;  %v264_v0 = vmul.f32 %v263_v61, %v257_v47 }
  0xe8   :  { %v276_v60 = vadd.f32 0.4994258, %v275_v59  ;;  %v265_v2 = vadd.f32 0.18741608, %v264_v0 }
  0xea   :  { %v277_v62 = vmul.f32 %v276_v60, %v257_v47  ;;  %v266_v5 = vmul.f32 %v265_v2, %v257_v47 }
  0xec   :  { %v278_v63 = vadd.f32 1.0, %v277_v62  ;;  %v267_v10 = vadd.f32 1.1283791, %v266_v5 }
  0xee   :  { %388 = vrcp.f32 %v278_v63  ;;  %v290_v9 = vand.u32 2147483648, %v278_v63  ;;  %v288_v12 = vand.u32 2147483647, %v278_v63  ;;  %vm284_vm6 = vweird.f32 %v278_v63 }
  0xef   :  { %390 = vpow2.f32 %v300_v7  ;;  %v268_v15 = vmul.f32 %v267_v10, %v255_v45 }
  0xf0   :  { %v291_v14 = vor.u32 1.1754944e-38, %v290_v9  ;;  %vm289_vm8 = vcmp.eq.f32.partialorder %v288_v12, 8.507059e+37 }
  0xf4   :  { %v389_v4 = vpop.eup %388 }
  0xf5   :  { %v280_v6 = vmul.f32 %v389_v4, %v278_v63  ;;  %vm285_vm5 = vweird.f32 %v389_v4  ;;  %v391_v20 = vpop.eup %390 }
  0xf6   :  { %vm286_vm7 = vmor %vm284_vm6, %vm285_vm5  ;;  %v302_v25 = vmul.f32 0.3989423, %v391_v20 }
  0xf7   :  { %v281_v8 = vsub.f32 1.0, %v280_v6 }
  0xf8   :  { %v308_v31 = vmul.f32 %v302_v25, %v253_v21  ;;  %v304_v33 = vmul.f32 %v303_v27, %v302_v25 }
  0xf9   :  { %v282_v11 = vmul.f32 %v389_v4, %v281_v8 }
  0xfb   :  { %v283_v13 = vadd.f32 %v389_v4, %v282_v11 }
  0xfd   :  { %v287_v16 = vsel %vm286_vm7, %v389_v4, %v283_v13 }
  0xfe   :  { %v292_v17 = vsel %vm289_vm8, %v291_v14, %v287_v16 }
  0xff   :  { %v293_v18 = vmul.f32 %v292_v17, %v268_v15 }
 0x101   :  { %v373_v22 = vclamps-f32 %v293_v18, 1.0 }
 0x103   :  { %v296_v24 = vadd.f32 1.0, %v373_v22 }
 0x105   :  { %v297_v26 = vmul.f32 0.5, %v296_v24 }
 0x107   :  { %v307_v30 = vmul.f32 %v297_v26, %v640_v42  ;;  %v310_v34 = vmul.f32 %v306_v28, %v297_v26 }
 0x109   :  { %v309_v35 = vadd.f32 %v308_v31, %v307_v30  ;;  %v311_v37 = vadd.f32 %v310_v34, %v304_v33 }
 0x10b   :  { %v318_v19 = vsel %vm241_vm1, %v317_v36, %v309_v35  ;;  %v312_v38 = vmul.f32 %v309_v35, %v309_v35 }
 0x10c   :  { %321 = vst.msk [vmem:[#allocation12] sm:$0xff] %vm90_vm0, %v318_v19 }
 0x10d   :  { %333 = dma.vmem_to_hbm [thread:$0]  %s329_s5, 128, %s331_s25, [#allocation6]   ;;  %v313_v39 = vsub.f32 %v311_v37, %v312_v38 }
 0x10f   :  { %v319_v40 = vmax.f32 %v313_v39, 0.0 }
 0x111   :  { %v320_v41 = vsel %vm241_vm1, 0.0, %v319_v40 }
 0x112   :  { %322 = vst.msk [vmem:[#allocation13] sm:$0xff] %vm90_vm0, %v320_v41 }
 0x113   :  { %344 = dma.vmem_to_hbm [thread:$0]  %s340_s27, 128, %s342_s6, [#allocation14]  }
 0x114   :  { %542 = dma.done.wait [#allocation6], 128  }
 0x115   :  { %543 = vsyncadd [#allocation6], 4294967168 }
 0x116   :  { %544 = dma.done.wait [#allocation14], 128  }
 0x117   :  { %545 = vsyncadd [#allocation14], 4294967168 }
 0x118   :  { %353 = vsyncpa [#allocation5], 1 }
 0x119   :  { %354 = vsyncpa [#allocation8], 1 }
 0x11a   :  { %355 = vsyncpa [#allocation11], 1 }
 0x11b   :  { %356 = vsyncpa [#allocation6], 1 }
 0x11c   :  { %357 = vsyncpa [#allocation14], 1 }

</bundles_post_ra>
